<compile_context>
chip_gen: v7x
topology: tpu7x:2x2x1
jax: 0.10.0
libtpu: 0.0.40
codegen_flags: <defaults>
</compile_context>

<pallas_src>
import jax
import jax.numpy as jnp
from jax.experimental import pallas as pl
from jax.experimental.pallas import tpu as pltpu


def _weight_sparse_kernel(x_ref, w_ref, o_ref):
    # x_ref: (TB, TN) tile, w_ref: (1, TN) tile -> sublane-broadcast VPU multiply.
    o_ref[...] = x_ref[...] * w_ref[...]


def _round_up(v: int, m: int) -> int:
    return ((v + m - 1) // m) * m


def _weight_sparse_pallas(x2d: jax.Array, w2d: jax.Array, tb: int, tn: int) -> jax.Array:
    batch, in_nodes = x2d.shape
    nj = pl.cdiv(in_nodes, tn)  # outer: in_nodes tiles (weight block reuse)
    ni = pl.cdiv(batch, tb)     # inner: batch tiles (streamed)

    itemsize = jnp.dtype(x2d.dtype).itemsize
    # Double-buffered x + out blocks, tiny weight tile, plus headroom.
    vmem_bytes = 2 * 2 * tb * tn * itemsize + 2 * tn * itemsize + (4 << 20)
    vmem_bytes = min(max(vmem_bytes, 8 << 20), 32 << 20)  # fits every generation

    return pl.pallas_call(
        _weight_sparse_kernel,
        out_shape=jax.ShapeDtypeStruct((batch, in_nodes), x2d.dtype),
        grid=(nj, ni),
        in_specs=[
            pl.BlockSpec((tb, tn), lambda j, i: (i, j)),   # x tile
            pl.BlockSpec((1, tn), lambda j, i: (0, j)),    # weight row tile
        ],
        out_specs=pl.BlockSpec((tb, tn), lambda j, i: (i, j)),
        compiler_params=pltpu.CompilerParams(
            dimension_semantics=("parallel", "parallel"),
            vmem_limit_bytes=vmem_bytes,
        ),
    )(x2d, w2d)


def weight_sparse(x: jax.Array, weight: jax.Array, *, force_pallas: bool = False) -> jax.Array:
    """Forward of Weight_Sparse: x * weight, broadcasting weight over leading dims."""
    assert weight.ndim == 1
    in_nodes = weight.shape[0]
    assert x.shape[-1] == in_nodes, "last dim of x must equal in_features"

    orig_shape = x.shape
    x2d = x.reshape(-1, in_nodes)
    batch = x2d.shape[0]
    w = weight.astype(x.dtype)

    # Tiny problems: pallas_call launch/DMA overhead and <128-lane masked
    # stores make plain XLA strictly faster; skip the kernel.
    if not force_pallas and (in_nodes < 128 or batch * in_nodes < 8 * 128):
        return (x2d * w[None, :]).reshape(orig_shape)

    # Tile sizes: largest (8,128)-aligned tiles up to 512x512.
    tb = min(_round_up(batch, 8), 512)
    tn = min(_round_up(in_nodes, 128), 512)

    out2d = _weight_sparse_pallas(x2d, w.reshape(1, in_nodes), tb, tn)
    return out2d.reshape(orig_shape)


if __name__ == "__main__":
    key = jax.random.PRNGKey(0)
    kx, kw = jax.random.split(key)

    # Small shapes consistent with the module (in_features >= 128 so the
    # Pallas path is exercised with lane-dense output blocks).
    batch, in_features = 64, 256
    x = jax.random.normal(kx, (batch, in_features), dtype=jnp.float32)
    # Matches nn.Parameter(...).uniform_(0, 1) init.
    weight = jax.random.uniform(kw, (in_features,), dtype=jnp.float32)

    out = jax.block_until_ready(weight_sparse(x, weight))
    ref = x * weight[None, :]
    assert out.shape == ref.shape and out.dtype == ref.dtype
    assert jnp.allclose(out, ref, atol=1e-6, rtol=1e-6), "mismatch vs reference"

    # Also exercise a ragged case (batch/in_nodes not multiples of the tiles).
    x2 = jax.random.normal(kx, (1000, 384), dtype=jnp.float32)
    w2 = jax.random.uniform(kw, (384,), dtype=jnp.float32)
    out2 = jax.block_until_ready(weight_sparse(x2, w2))
    ref2 = x2 * w2[None, :]
    assert jnp.allclose(out2, ref2, atol=1e-6, rtol=1e-6), "ragged mismatch vs reference"

    print("KERNEL_OK")
</pallas_src>

<mosaic_0001>
module attributes {stable_mosaic.version = 11 : i64} {
  func.func @_weight_sparse_kernel(%arg0: i32, %arg1: i32, %arg2: memref<64x256xf32, #tpu.memory_space<vmem>>, %arg3: memref<1x256xf32, #tpu.memory_space<vmem>>, %arg4: memref<64x256xf32, #tpu.memory_space<vmem>>) attributes {dimension_semantics = [#tpu.dimension_semantics<parallel>, #tpu.dimension_semantics<parallel>], iteration_bounds = array<i64: 1, 1>, scalar_prefetch = 0 : i64, scratch_operands = 0 : i64, tpu.core_type = #tpu.core_type<tc>, window_params = [{transform_indices = @transform_0, window_bounds = array<i64: 64, 256>}, {transform_indices = @transform_1, window_bounds = array<i64: 1, 256>}, {transform_indices = @transform_2, window_bounds = array<i64: 64, 256>}]} {
    %c0 = arith.constant 0 : index
    %c0_0 = arith.constant 0 : index
    %0 = vector.load %arg2[%c0, %c0_0] : memref<64x256xf32, #tpu.memory_space<vmem>>, vector<64x256xf32>
    %c0_1 = arith.constant 0 : index
    %c0_2 = arith.constant 0 : index
    %1 = vector.load %arg3[%c0_1, %c0_2] : memref<1x256xf32, #tpu.memory_space<vmem>>, vector<1x256xf32>
    %2 = vector.broadcast %1 : vector<1x256xf32> to vector<64x256xf32>
    %3 = arith.mulf %0, %2 : vector<64x256xf32>
    %c0_3 = arith.constant 0 : index
    %c0_4 = arith.constant 0 : index
    %4 = vector.load %arg4[%c0_3, %c0_4] : memref<64x256xf32, #tpu.memory_space<vmem>>, vector<64x256xf32>
    tpu.vector_store %arg4[%c0_3, %c0_4], %3 {strides = array<i32>} : memref<64x256xf32, #tpu.memory_space<vmem>>, vector<64x256xf32>,
    return
  }
  func.func @transform_0(%arg0: i32, %arg1: i32) -> (i32, i32) {
    %c0_i32 = arith.constant 0 : i32
    return %arg1, %arg0 : i32, i32
  }
  func.func @transform_1(%arg0: i32, %arg1: i32) -> (i32, i32) {
    %c0_i32 = arith.constant 0 : i32
    %c0_i32_0 = arith.constant 0 : i32
    return %c0_i32, %arg0 : i32, i32
  }
  func.func @transform_2(%arg0: i32, %arg1: i32) -> (i32, i32) {
    %c0_i32 = arith.constant 0 : i32
    return %arg1, %arg0 : i32, i32
  }
}

</mosaic_0001>

<bundles_post_ra>
// kernel: tpu_custom_call.1
= control target key start
LH: loop header
LB: loop body
LE: loop exit
PB: predicated region body
PF: predicated region fallthrough
CT: control target
= control target key end

     0   :  { %7 = vsyncpa [#allocation3], 0  ;;  %s207_s0 = inlined_call_operand.hbm [shape: f32[64,256], index: 0, kind: input, shape index: {}]   ;;  %s208_s1 = inlined_call_operand.vmem [shape: f32[1,256], index: 1, kind: input, shape index: {}]   ;;  %s209_s2 = inlined_call_operand.hbm [shape: f32[64,256], index: 2, kind: output, shape index: {}]  }
   0x1   :  { %8 = vsyncpa [#allocation4], 0  ;;  %s155_s9 = smov [#allocation2]   ;;  %s107_s13 = scalar_lea.hbm %s207_s0, 2048 }
   0x2   :  { %s14_s10 = sshll.u32 %s155_s9, 4  ;;  %p108_p0 = scmp.ne.s32.totalorder %s207_s0, %s107_s13  ;;  %s15_s10 = int_to_ptr.vmem [resolvable:$true] %s14_s10 }
   0x3   :  { %p111_p1 = scmp.lt.u32.totalorder %s107_s13, %s207_s0 }
   0x5   :  { %p113_p2 = pnand %p111_p1, %p108_p0 }
   0x7   :  { %116 = shalt.err (!%p113_p2)
}
   0x8   :  { %s117_s18 = scalar_lea.vmem %s15_s10, 2048  ;;  %p122_p4 = scmp.lt.s32.totalorder %s15_s10, %s15_s10 }
   0x9   :  { %p118_p3 = scmp.ne.s32.totalorder %s15_s10, %s117_s18  ;;  %p123_p5 = scmp.lt.s32.totalorder %s117_s18, %s117_s18 }
   0xb   :  { %p124_p6 = por %p123_p5, %p122_p4 }
   0xd   :  { %p125_p7 = pnand %p124_p6, %p118_p3 }
   0xf   :  { %128 = shalt.err (!%p125_p7)
}
  0x10   :  { %s156_s19 = smov 256   ;;  %s157_s20 = smov 16  }
  0x11   :  { %20 = dma.hbm_to_vmem [thread:$0]  %s207_s0, 2048, %s15_s10, [#allocation3], %s156_s19, %s156_s19, %s157_s20  }
  0x12   :  { %151 = dma.done.wait [#allocation3], 2048  }
  0x13   :  { %152 = vsyncadd [#allocation3], 4294965248  ;;  %v44_v0 = vlaneseq  ;;  %v26_v4 = vld [vmem:[#allocation2] sm:$0xff]  ;;  %v27_v6 = vld [vmem:[#allocation2 + $0x8] sm:$0xff]  ;;  %s158_s0 = smov [#allocation5]  }
  0x14   :  { %v42_v5 = vld [vmem:[%s208_s1] sm:$0x3]  ;;  %v28_v9 = vld [vmem:[#allocation2 + $0x10] sm:$0xff]  ;;  %v29_v10 = vld [vmem:[#allocation2 + $0x18] sm:$0xff]  ;;  %s91_s25 = sshll.u32 %s158_s0, 4  ;;  %s92_s25 = int_to_ptr.vmem [resolvable:$true] %s91_s25 }
  0x15   :  { %v45_v1 = vshrl.u32 %v44_v0, 7  ;;  %v30_v11 = vld [vmem:[#allocation2 + $0x20] sm:$0xff]  ;;  %v31_v12 = vld [vmem:[#allocation2 + $0x28] sm:$0xff]  ;;  %v32_v13 = vld [vmem:[#allocation2 + $0x30] sm:$0xff]  ;;  %s129_s1 = scalar_lea.vmem %s92_s25, 2048  ;;  %p134_p9 = scmp.lt.s32.totalorder %s92_s25, %s92_s25 }
  0x16   :  { %v33_v14 = vld [vmem:[#allocation2 + $0x38] sm:$0xff]  ;;  %v34_v19 = vld [vmem:[#allocation2 + $0x40] sm:$0xff]  ;;  %v35_v20 = vld [vmem:[#allocation2 + $0x48] sm:$0xff]  ;;  %p130_p8 = scmp.ne.s32.totalorder %s92_s25, %s129_s1  ;;  %p135_p10 = scmp.lt.s32.totalorder %s129_s1, %s129_s1 }
  0x17   :  { %v46_v2 = vsub.s32 0, %v45_v1  ;;  %v50_v3 = vsub.s32 1, %v45_v1  ;;  %v36_v21 = vld [vmem:[#allocation2 + $0x50] sm:$0xff]  ;;  %v37_v26 = vld [vmem:[#allocation2 + $0x58] sm:$0xff]  ;;  %v38_v27 = vld [vmem:[#allocation2 + $0x60] sm:$0xff] }
  0x18   :  { %v39_v28 = vld [vmem:[#allocation2 + $0x68] sm:$0xff]  ;;  %v40_v33 = vld [vmem:[#allocation2 + $0x70] sm:$0xff]  ;;  %v41_v34 = vld [vmem:[#allocation2 + $0x78] sm:$0xff]  ;;  %p136_p11 = por %p135_p10, %p134_p9 }
  0x19   :  { %v47_v7 = vrot.slane %v42_v5, %v46_v2  ;;  %v51_v8 = vrot.slane %v42_v5, %v50_v3 }
  0x1a   :  { %p137_p12 = pnand %p136_p11, %p130_p8 }
  0x1b   :  { %v54_v15 = vmul.f32 %v47_v7, %v26_v4  ;;  %v55_v16 = vmul.f32 %v51_v8, %v27_v6  ;;  %v56_v17 = vmul.f32 %v47_v7, %v28_v9  ;;  %v57_v18 = vmul.f32 %v51_v8, %v29_v10 }
  0x1c   :  { %v58_v22 = vmul.f32 %v47_v7, %v30_v11  ;;  %v59_v23 = vmul.f32 %v51_v8, %v31_v12  ;;  %v60_v24 = vmul.f32 %v47_v7, %v32_v13  ;;  %v61_v25 = vmul.f32 %v51_v8, %v33_v14 }
  0x1d   :  { %70 = vst [vmem:[#allocation5] sm:$0xff] %v54_v15  ;;  %71 = vst [vmem:[#allocation5 + $0x8] sm:$0xff] %v55_v16  ;;  %v62_v29 = vmul.f32 %v47_v7, %v34_v19  ;;  %v63_v30 = vmul.f32 %v51_v8, %v35_v20  ;;  %v64_v31 = vmul.f32 %v47_v7, %v36_v21 }
  0x1e   :  { %72 = vst [vmem:[#allocation5 + $0x10] sm:$0xff] %v56_v17  ;;  %73 = vst [vmem:[#allocation5 + $0x18] sm:$0xff] %v57_v18  ;;  %v65_v32 = vmul.f32 %v51_v8, %v37_v26  ;;  %v66_v35 = vmul.f32 %v47_v7, %v38_v27  ;;  %v67_v36 = vmul.f32 %v51_v8, %v39_v28 }
  0x1f   :  { %74 = vst [vmem:[#allocation5 + $0x20] sm:$0xff] %v58_v22  ;;  %75 = vst [vmem:[#allocation5 + $0x28] sm:$0xff] %v59_v23  ;;  %v68_v37 = vmul.f32 %v47_v7, %v40_v33  ;;  %v69_v38 = vmul.f32 %v51_v8, %v41_v34 }
  0x20   :  { %76 = vst [vmem:[#allocation5 + $0x30] sm:$0xff] %v60_v24  ;;  %77 = vst [vmem:[#allocation5 + $0x38] sm:$0xff] %v61_v25 }
  0x21   :  { %78 = vst [vmem:[#allocation5 + $0x40] sm:$0xff] %v62_v29  ;;  %79 = vst [vmem:[#allocation5 + $0x48] sm:$0xff] %v63_v30 }
  0x22   :  { %80 = vst [vmem:[#allocation5 + $0x50] sm:$0xff] %v64_v31  ;;  %81 = vst [vmem:[#allocation5 + $0x58] sm:$0xff] %v65_v32 }
  0x23   :  { %82 = vst [vmem:[#allocation5 + $0x60] sm:$0xff] %v66_v35  ;;  %83 = vst [vmem:[#allocation5 + $0x68] sm:$0xff] %v67_v36 }
  0x24   :  { %84 = vst [vmem:[#allocation5 + $0x70] sm:$0xff] %v68_v37  ;;  %85 = vst [vmem:[#allocation5 + $0x78] sm:$0xff] %v69_v38 }
  0x25   :  { %140 = shalt.err (!%p137_p12)
}
  0x26   :  { %s141_s28 = scalar_lea.hbm %s209_s2, 2048 }
  0x27   :  { %p142_p13 = scmp.ne.s32.totalorder %s209_s2, %s141_s28  ;;  %p145_p0 = scmp.lt.u32.totalorder %s141_s28, %s209_s2 }
  0x29   :  { %p147_p1 = pnand %p145_p0, %p142_p13 }
  0x2b   :  { %150 = shalt.err (!%p147_p1)
}
  0x2c   :  { %97 = dma.vmem_to_hbm [thread:$0]  %s92_s25, 2048, %s209_s2, [#allocation4], %s156_s19, %s156_s19, %s157_s20  }
  0x2d   :  { %153 = dma.done.wait [#allocation4], 2048  }
  0x2e   :  { %154 = vsyncadd [#allocation4], 4294965248 }
  0x2f   :  { %101 = vsyncpa [#allocation3], 1 }
  0x30   :  { %102 = vsyncpa [#allocation4], 1 }

</bundles_post_ra>
